<compile_context>
chip_gen: v6e
topology: v6e:2x2x1
jax: 0.10.0
libtpu: 0.0.40
codegen_flags: <defaults>
</compile_context>

<pallas_src>
import functools

import jax
import jax.numpy as jnp
from jax.experimental import pallas as pl
from jax.experimental.pallas import tpu as pltpu


def _round_up(x, m):
    return (x + m - 1) // m * m


def _adjusted_lr(lr, epoch, schedule=(35, 45)):
    for milestone in schedule:
        if epoch >= milestone:
            lr *= 0.1
    return lr


def _ce_rowgrad_kernel(i_ref, feat_ref, w_ref, lbl_ref,
                       loss_part_ref, grad_part_ref,
                       loss_acc, grad_acc,
                       *, n_real, c_real, tiles_per_core,
                       need_class_mask, need_row_mask):
    """Per-tile CE-loss partial sum + row-i gradient partial sum.

    grid = (num_cores [parallel], tiles_per_core [arbitrary / batch reduction]).
    Outputs are per-core partial sums; mean / max_val / SGD happen in XLA.
    """
    c = pl.program_id(0)
    g = pl.program_id(1)
    n_inner = pl.num_programs(1)
    i = i_ref[0]

    @pl.when(g == 0)
    def _init():
        loss_acc[...] = jnp.zeros_like(loss_acc)
        grad_acc[...] = jnp.zeros_like(grad_acc)

    X = feat_ref[...]                       # [TN, D_pad]  mxu dtype (bf16)
    W = w_ref[...]                          # [C_pad, D_pad] mxu dtype, resident
    lbl = lbl_ref[...]                      # [TN, 1] int32
    TN = X.shape[0]
    C_pad = W.shape[0]

    col_c = jax.lax.broadcasted_iota(jnp.int32, (TN, C_pad), 1)

    # ---- logits for this batch tile (MXU, f32 accumulation) ----
    logits = jnp.einsum('nd,cd->nc', X, W, preferred_element_type=jnp.float32)
    if need_class_mask:
        logits = jnp.where(col_c < c_real, logits, jnp.float32(-1e30))

    # ---- cross-entropy per-row loss (mean applied in the epilogue) ----
    m = jnp.max(logits, axis=-1, keepdims=True)
    e = jnp.exp(logits - m)
    s = jnp.sum(e, axis=-1, keepdims=True)
    lse = jnp.log(s) + m                                         # [TN, 1]
    picked = jnp.sum(jnp.where(lbl == col_c, logits, 0.0),
                     axis=-1, keepdims=True)                     # [TN, 1]
    per_row = lse - picked                                       # [TN, 1]

    # ---- softmax column i only (full [TN, C_pad] softmax never formed) ----
    e_i = jnp.sum(jnp.where(col_c == i, e, 0.0), axis=-1, keepdims=True)
    p_i = e_i * pl.reciprocal(s, approx=True)                    # [TN, 1]
    y_i = (lbl == i).astype(jnp.float32)
    dlog_i = p_i - y_i                                           # [TN, 1]

    if need_row_mask:
        row_ids = ((c * tiles_per_core + g) * TN
                   + jax.lax.broadcasted_iota(jnp.int32, (TN, 1), 0))
        row_valid = (row_ids < n_real).astype(jnp.float32)
        per_row = per_row * row_valid
        dlog_i = dlog_i * row_valid

    loss_acc[...] += jnp.sum(per_row).reshape(1, 1)
    grad_acc[...] += jnp.sum(dlog_i * X.astype(jnp.float32),
                             axis=0, keepdims=True)              # [1, D_pad]

    # ---- write this core's partial sums on the last batch tile ----
    @pl.when(g == n_inner - 1)
    def _finalize():
        loss_part_ref[...] = jnp.broadcast_to(loss_acc[...], loss_part_ref.shape)
        grad_part_ref[...] = jnp.broadcast_to(grad_acc[...], grad_part_ref.shape)


def regularized_logit_forward(W, features, labels, i, k, *,
                              lamb, lr, wd,
                              mxu_dtype=jnp.bfloat16,   # f32 vector math stays f32
                              tile_n=1024,
                              num_cores=2,              # v7x: both TensorCores
                              vmem_limit_bytes=48 * 1024 * 1024):
    """Glue: lr schedule, lane-dense padding, batch tiling, pallas_call, epilogue."""
    C, D = W.shape
    N = features.shape[0]
    lr_eff = _adjusted_lr(lr, k)

    D_pad = _round_up(D, 128)
    C_pad = _round_up(C, 128)

    # crude VMEM budget for the batch tile: ~3 live [TN, C_pad] f32
    # intermediates + double-buffered mxu-dtype X tiles under ~half the limit.
    itemsize = jnp.dtype(mxu_dtype).itemsize
    per_row_bytes = 3 * C_pad * 4 + 2 * D_pad * itemsize
    tn_cap = max(16, (vmem_limit_bytes // 2 // per_row_bytes) // 16 * 16)
    TN = max(16, min(tile_n, tn_cap, _round_up(N, 16)))
    N_pad = _round_up(N, TN * num_cores)
    tiles_per_core = N_pad // (TN * num_cores)

    W32 = W.astype(jnp.float32)
    # casts & padding hoisted out of the kernel (bf16 halves the HBM X stream)
    W_mm = jnp.zeros((C_pad, D_pad), mxu_dtype).at[:C, :D].set(W.astype(mxu_dtype))
    X_mm = jnp.zeros((N_pad, D_pad), mxu_dtype).at[:N, :D].set(
        features.astype(mxu_dtype))
    L_p = jnp.zeros((N_pad, 1), jnp.int32).at[:N, 0].set(labels.astype(jnp.int32))
    i_arr = jnp.array([i], dtype=jnp.int32)

    need_class_mask = C_pad != C
    need_row_mask = N_pad != N

    kernel = functools.partial(
        _ce_rowgrad_kernel, n_real=N, c_real=C, tiles_per_core=tiles_per_core,
        need_class_mask=need_class_mask, need_row_mask=need_row_mask)

    grid_spec = pltpu.PrefetchScalarGridSpec(
        num_scalar_prefetch=1,                        # class index i -> SMEM
        grid=(num_cores, tiles_per_core),
        in_specs=[
            # features batch tile (pipelined over the reduction axis)
            pl.BlockSpec((TN, D_pad),
                         lambda c, g, i_ref: (c * tiles_per_core + g, 0)),
            # W (mxu dtype, constant block index -> resident)
            pl.BlockSpec((C_pad, D_pad), lambda c, g, i_ref: (0, 0)),
            # int32 labels tile (no dense one-hot DMA)
            pl.BlockSpec((TN, 1),
                         lambda c, g, i_ref: (c * tiles_per_core + g, 0)),
        ],
        out_specs=[
            pl.BlockSpec((8, 128), lambda c, g, i_ref: (c, 0)),     # loss partials
            pl.BlockSpec((8, D_pad), lambda c, g, i_ref: (c, 0)),   # grad-row partials
        ],
        scratch_shapes=[
            pltpu.VMEM((1, 1), jnp.float32),          # CE loss partial sum
            pltpu.VMEM((1, D_pad), jnp.float32),      # grad row accumulator
        ],
    )

    cost = pl.CostEstimate(
        flops=2 * N_pad * C_pad * D_pad + 6 * N_pad * C_pad + 4 * N_pad * D_pad,
        transcendentals=N_pad * C_pad + 2 * N_pad,
        bytes_accessed=(itemsize * (N_pad * D_pad + num_cores * C_pad * D_pad)
                        + 4 * N_pad + 4 * num_cores * 8 * (128 + D_pad)),
    )

    loss_parts, grad_parts = pl.pallas_call(
        kernel,
        grid_spec=grid_spec,
        out_shape=(
            jax.ShapeDtypeStruct((num_cores * 8, 128), jnp.float32),
            jax.ShapeDtypeStruct((num_cores * 8, D_pad), jnp.float32),
        ),
        compiler_params=pltpu.CompilerParams(
            dimension_semantics=("parallel", "arbitrary"),
            vmem_limit_bytes=vmem_limit_bytes),
        cost_estimate=cost,
    )(i_arr, X_mm, W_mm, L_p)

    # ---- tiny XLA epilogue (all exact f32) ----
    sup_loss = jnp.sum(loss_parts.reshape(num_cores, 8, 128)[:, 0, 0]) / N
    grad_i = jnp.sum(grad_parts.reshape(num_cores, 8, D_pad)[:, 0, :D], axis=0) / N

    # detached compute_cos(i): max_{j != i} (W @ W.T)[i, j]  (exact f32 matvec)
    row = W32[i] @ W32.T
    max_val = jnp.max(jnp.where(jnp.arange(C) != i, row, -jnp.inf))
    loss = lamb / 2.0 * max_val + sup_loss

    # fused SGD step on the original f32 W (first step == momentum-free):
    #   rows j != i: weight decay only; row i: weight decay + grad_i
    w_new = W32 * (1.0 - lr_eff * wd)
    w_new = w_new.at[i].add(-lr_eff * grad_i)
    return w_new, loss, grad_i


def _reference_forward(W, features, labels, i, k, *, lamb, lr, wd):
    """Pure-JAX reference mirroring the torch semantics."""
    C, D = W.shape
    N = features.shape[0]
    lr_eff = _adjusted_lr(lr, k)

    dist = W @ W.T
    row = dist[i]
    mask = jnp.arange(C) != i
    max_val = jnp.max(jnp.where(mask, row, -jnp.inf))

    logits = features @ W.T
    logz = jax.scipy.special.logsumexp(logits, axis=-1)
    ce = jnp.mean(logz - logits[jnp.arange(N), labels])
    loss = lamb / 2.0 * max_val + ce

    probs = jax.nn.softmax(logits, axis=-1)
    Y = jax.nn.one_hot(labels, C, dtype=jnp.float32)
    gradW = (probs - Y).T @ features / N

    grad_masked = jnp.zeros_like(gradW).at[i].set(gradW[i])
    w_new = W - lr_eff * (grad_masked + wd * W)
    return w_new, loss, gradW[i]


if __name__ == "__main__":
    # small shapes implied by the module: W [num_classes, hidden], features [N, hidden]
    C, D, N = 8, 32, 16
    lamb, lr, wd = 0.5, 0.1, 1e-4
    i, k = 3, 40          # class index, epoch (k >= 35 -> lr * 0.1)

    key = jax.random.PRNGKey(0)
    kW, kF, kL = jax.random.split(key, 3)
    W = jax.random.normal(kW, (C, D), dtype=jnp.float32) * 0.1
    features = jax.random.normal(kF, (N, D), dtype=jnp.float32)
    labels = jax.random.randint(kL, (N,), 0, C, dtype=jnp.int32)

    w_new, loss, grad_i = regularized_logit_forward(
        W, features, labels, i, k, lamb=lamb, lr=lr, wd=wd)
    jax.block_until_ready((w_new, loss, grad_i))

    w_ref, loss_ref, grad_ref = _reference_forward(
        W, features, labels, i, k, lamb=lamb, lr=lr, wd=wd)

    # bf16 MXU operands + approx EUP reciprocal in the softmax column -> loosen
    # logit-derived tolerances; max_val & the SGD scaling path stay exact f32.
    assert jnp.allclose(loss, loss_ref, rtol=2e-2, atol=2e-2), "loss mismatch"
    assert jnp.allclose(grad_i, grad_ref, rtol=2e-2, atol=1e-2), "grad mismatch"
    assert jnp.allclose(w_new, w_ref, rtol=1e-4, atol=1e-4), "W mismatch"

    print("KERNEL_OK")
</pallas_src>

<mosaic_0001>
module attributes {stable_mosaic.version = 11 : i64} {
  func.func @_ce_rowgrad_kernel(%arg0: i32, %arg1: i32, %arg2: memref<1xi32, #tpu.memory_space<smem>>, %arg3: memref<16x128xbf16, #tpu.memory_space<vmem>>, %arg4: memref<128x128xbf16, #tpu.memory_space<vmem>>, %arg5: memref<16x1xi32, #tpu.memory_space<vmem>>, %arg6: memref<8x128xf32, #tpu.memory_space<vmem>>, %arg7: memref<8x128xf32, #tpu.memory_space<vmem>>, %arg8: memref<1x1xf32, #tpu.memory_space<vmem>>, %arg9: memref<1x128xf32, #tpu.memory_space<vmem>>) attributes {dimension_semantics = [#tpu.dimension_semantics<parallel>, #tpu.dimension_semantics<arbitrary>], iteration_bounds = array<i64: 2, 1>, scalar_prefetch = 1 : i64, scratch_operands = 2 : i64, tpu.core_type = #tpu.core_type<tc>, window_params = [{transform_indices = @transform_0, window_bounds = array<i64: 16, 128>}, {pipeline_mode = #tpu.pipeline_mode<synchronous>, transform_indices = @transform_1, window_bounds = array<i64: 128, 128>}, {transform_indices = @transform_2, window_bounds = array<i64: 16, 1>}, {transform_indices = @transform_3, window_bounds = array<i64: 8, 128>}, {transform_indices = @transform_4, window_bounds = array<i64: 8, 128>}]} {
    %c0 = arith.constant 0 : index
    %0 = memref.load %arg2[%c0] : memref<1xi32, #tpu.memory_space<smem>>
    %c0_i32 = arith.constant 0 : i32
    %1 = arith.cmpi eq, %arg1, %c0_i32 : i32
    %2 = arith.extui %1 : i1 to i32
    %c0_i32_0 = arith.constant 0 : i32
    %3 = arith.cmpi ne, %2, %c0_i32_0 : i32
    scf.if %3 {
      %cst_27 = arith.constant 0.000000e+00 : f32
      %73 = vector.broadcast %cst_27 : f32 to vector<1x1xf32>
      %c0_28 = arith.constant 0 : index
      %c0_29 = arith.constant 0 : index
      %74 = vector.load %arg8[%c0_28, %c0_29] : memref<1x1xf32, #tpu.memory_space<vmem>>, vector<1x1xf32>
      tpu.vector_store %arg8[%c0_28, %c0_29], %73 {strides = array<i32>} : memref<1x1xf32, #tpu.memory_space<vmem>>, vector<1x1xf32>,
      %cst_30 = arith.constant 0.000000e+00 : f32
      %75 = vector.broadcast %cst_30 : f32 to vector<1x128xf32>
      %c0_31 = arith.constant 0 : index
      %c0_32 = arith.constant 0 : index
      %76 = vector.load %arg9[%c0_31, %c0_32] : memref<1x128xf32, #tpu.memory_space<vmem>>, vector<1x128xf32>
      tpu.vector_store %arg9[%c0_31, %c0_32], %75 {strides = array<i32>} : memref<1x128xf32, #tpu.memory_space<vmem>>, vector<1x128xf32>,
    } else {
    }
    %c0_1 = arith.constant 0 : index
    %c0_2 = arith.constant 0 : index
    %4 = vector.load %arg3[%c0_1, %c0_2] : memref<16x128xbf16, #tpu.memory_space<vmem>>, vector<16x128xbf16>
    %c0_3 = arith.constant 0 : index
    %c0_4 = arith.constant 0 : index
    %5 = vector.load %arg4[%c0_3, %c0_4] : memref<128x128xbf16, #tpu.memory_space<vmem>>, vector<128x128xbf16>
    %c0_5 = arith.constant 0 : index
    %c0_6 = arith.constant 0 : index
    %6 = vector.load %arg5[%c0_5, %c0_6] : memref<16x1xi32, #tpu.memory_space<vmem>>, vector<16x1xi32>
    %7 = tpu.iota {dimensions = array<i32: 1>} : vector<16x128xi32>
    "tpu.trace_start"() <{level = 10 : i32, message = "nd,cd->nc"}> : () -> ()
    %cst = arith.constant dense<0.000000e+00> : vector<16x128xf32>
    %8 = tpu.matmul %4, %5, %cst {dimension_numbers = #tpu.dot_dimension_numbers<[1], [1], [0], [0], [0, 0, 1, 0], [], []>} : vector<16x128xbf16>, vector<128x128xbf16>, vector<16x128xf32> -> vector<16x128xf32>
    %c8_i32 = arith.constant 8 : i32
    "tpu.trace_stop"() : () -> ()
    %9 = vector.broadcast %c8_i32 : i32 to vector<16x128xi32>
    %10 = arith.cmpi slt, %7, %9 : vector<16x128xi32>
    %cst_7 = arith.constant -1.000000e+30 : f32
    %11 = vector.broadcast %cst_7 : f32 to vector<16x128xf32>
    %12 = arith.select %10, %8, %11 : vector<16x128xi1>, vector<16x128xf32>
    %cst_8 = arith.constant dense<0xFF800000> : vector<16xf32>
    %13 = vector.multi_reduction <maximumf>, %12, %cst_8 [1] : vector<16x128xf32> to vector<16xf32>
    %14 = vector.shape_cast %13 : vector<16xf32> to vector<16x1xf32>
    %15 = vector.broadcast %14 : vector<16x1xf32> to vector<16x128xf32>
    %16 = arith.subf %12, %15 : vector<16x128xf32>
    %17 = math.exp %16 : vector<16x128xf32>
    %cst_9 = arith.constant dense<0.000000e+00> : vector<16xf32>
    %18 = vector.multi_reduction <add>, %17, %cst_9 [1] : vector<16x128xf32> to vector<16xf32>
    %19 = vector.shape_cast %18 : vector<16xf32> to vector<16x1xf32>
    %20 = math.log %19 : vector<16x1xf32>
    %21 = arith.addf %20, %14 : vector<16x1xf32>
    %22 = vector.broadcast %6 : vector<16x1xi32> to vector<16x128xi32>
    %23 = arith.cmpi eq, %22, %7 : vector<16x128xi32>
    %cst_10 = arith.constant 0.000000e+00 : f32
    %24 = vector.broadcast %cst_10 : f32 to vector<16x128xf32>
    %25 = arith.select %23, %12, %24 : vector<16x128xi1>, vector<16x128xf32>
    %cst_11 = arith.constant dense<0.000000e+00> : vector<16xf32>
    %26 = vector.multi_reduction <add>, %25, %cst_11 [1] : vector<16x128xf32> to vector<16xf32>
    %27 = vector.shape_cast %26 : vector<16xf32> to vector<16x1xf32>
    %28 = arith.subf %21, %27 : vector<16x1xf32>
    %29 = vector.broadcast %0 : i32 to vector<16x128xi32>
    %30 = arith.cmpi eq, %7, %29 : vector<16x128xi32>
    %cst_12 = arith.constant 0.000000e+00 : f32
    %31 = vector.broadcast %cst_12 : f32 to vector<16x128xf32>
    %32 = arith.select %30, %17, %31 : vector<16x128xi1>, vector<16x128xf32>
    %cst_13 = arith.constant dense<0.000000e+00> : vector<16xf32>
    %33 = vector.multi_reduction <add>, %32, %cst_13 [1] : vector<16x128xf32> to vector<16xf32>
    %34 = vector.shape_cast %33 : vector<16xf32> to vector<16x1xf32>
    %35 = tpu.reciprocal %19 {approx = true} : vector<16x1xf32> -> vector<16x1xf32>
    %36 = arith.mulf %34, %35 : vector<16x1xf32>
    %37 = vector.broadcast %0 : i32 to vector<16x1xi32>
    %38 = arith.cmpi eq, %6, %37 : vector<16x1xi32>
    %39 = arith.extui %38 : vector<16x1xi1> to vector<16x1xi32>
    %40 = arith.sitofp %39 : vector<16x1xi32> to vector<16x1xf32>
    %41 = arith.subf %36, %40 : vector<16x1xf32>
    %c1_i32 = arith.constant 1 : i32
    %42 = arith.muli %arg0, %c1_i32 : i32
    %43 = arith.addi %42, %arg1 : i32
    %c16_i32 = arith.constant 16 : i32
    %44 = arith.muli %43, %c16_i32 : i32
    %45 = tpu.iota {dimensions = array<i32: 0>} : vector<16x1xi32>
    %46 = vector.broadcast %44 : i32 to vector<16x1xi32>
    %47 = arith.addi %46, %45 : vector<16x1xi32>
    %c16_i32_14 = arith.constant 16 : i32
    %48 = vector.broadcast %c16_i32_14 : i32 to vector<16x1xi32>
    %49 = arith.cmpi slt, %47, %48 : vector<16x1xi32>
    %50 = arith.extui %49 : vector<16x1xi1> to vector<16x1xi32>
    %51 = arith.sitofp %50 : vector<16x1xi32> to vector<16x1xf32>
    %52 = arith.mulf %28, %51 : vector<16x1xf32>
    %53 = arith.mulf %41, %51 : vector<16x1xf32>
    %c0_15 = arith.constant 0 : index
    %c0_16 = arith.constant 0 : index
    %54 = vector.load %arg8[%c0_15, %c0_16] : memref<1x1xf32, #tpu.memory_space<vmem>>, vector<1x1xf32>
    %55 = vector.shape_cast %52 : vector<16x1xf32> to vector<1x16x1xf32>
    %cst_17 = arith.constant dense<0.000000e+00> : vector<1xf32>
    %56 = vector.multi_reduction <add>, %55, %cst_17 [1, 2] : vector<1x16x1xf32> to vector<1xf32>
    %57 = vector.shape_cast %56 : vector<1xf32> to vector<1x1x1xf32>
    %58 = vector.extract %57[0, 0, 0] : f32 from vector<1x1x1xf32>
    %59 = vector.broadcast %58 : f32 to vector<1x1xf32>
    %60 = arith.addf %54, %59 : vector<1x1xf32>
    %c0_18 = arith.constant 0 : index
    %c0_19 = arith.constant 0 : index
    %61 = vector.load %arg8[%c0_18, %c0_19] : memref<1x1xf32, #tpu.memory_space<vmem>>, vector<1x1xf32>
    tpu.vector_store %arg8[%c0_18, %c0_19], %60 {strides = array<i32>} : memref<1x1xf32, #tpu.memory_space<vmem>>, vector<1x1xf32>,
    %c0_20 = arith.constant 0 : index
    %c0_21 = arith.constant 0 : index
    %62 = vector.load %arg9[%c0_20, %c0_21] : memref<1x128xf32, #tpu.memory_space<vmem>>, vector<1x128xf32>
    %63 = arith.extf %4 : vector<16x128xbf16> to vector<16x128xf32>
    %64 = vector.broadcast %53 : vector<16x1xf32> to vector<16x128xf32>
    %65 = arith.mulf %64, %63 : vector<16x128xf32>
    %cst_22 = arith.constant dense<0.000000e+00> : vector<128xf32>
    %66 = vector.multi_reduction <add>, %65, %cst_22 [0] : vector<16x128xf32> to vector<128xf32>
    %67 = vector.shape_cast %66 : vector<128xf32> to vector<1x128xf32>
    %68 = arith.addf %62, %67 : vector<1x128xf32>
    %c0_23 = arith.constant 0 : index
    %c0_24 = arith.constant 0 : index
    %69 = vector.load %arg9[%c0_23, %c0_24] : memref<1x128xf32, #tpu.memory_space<vmem>>, vector<1x128xf32>
    tpu.vector_store %arg9[%c0_23, %c0_24], %68 {strides = array<i32>} : memref<1x128xf32, #tpu.memory_space<vmem>>, vector<1x128xf32>,
    %c0_i32_25 = arith.constant 0 : i32
    %70 = arith.cmpi eq, %arg1, %c0_i32_25 : i32
    %71 = arith.extui %70 : i1 to i32
    %c0_i32_26 = arith.constant 0 : i32
    %72 = arith.cmpi ne, %71, %c0_i32_26 : i32
    scf.if %72 {
      %c0_27 = arith.constant 0 : index
      %c0_28 = arith.constant 0 : index
      %73 = vector.load %arg8[%c0_27, %c0_28] : memref<1x1xf32, #tpu.memory_space<vmem>>, vector<1x1xf32>
      %74 = vector.shape_cast %73 : vector<1x1xf32> to vector<1x1xf32>
      %75 = vector.broadcast %74 : vector<1x1xf32> to vector<8x128xf32>
      %c0_29 = arith.constant 0 : index
      %c0_30 = arith.constant 0 : index
      %76 = vector.load %arg6[%c0_29, %c0_30] : memref<8x128xf32, #tpu.memory_space<vmem>>, vector<8x128xf32>
      tpu.vector_store %arg6[%c0_29, %c0_30], %75 {strides = array<i32>} : memref<8x128xf32, #tpu.memory_space<vmem>>, vector<8x128xf32>,
      %c0_31 = arith.constant 0 : index
      %c0_32 = arith.constant 0 : index
      %77 = vector.load %arg9[%c0_31, %c0_32] : memref<1x128xf32, #tpu.memory_space<vmem>>, vector<1x128xf32>
      %78 = vector.shape_cast %77 : vector<1x128xf32> to vector<1x128xf32>
      %79 = vector.broadcast %78 : vector<1x128xf32> to vector<8x128xf32>
      %c0_33 = arith.constant 0 : index
      %c0_34 = arith.constant 0 : index
      %80 = vector.load %arg7[%c0_33, %c0_34] : memref<8x128xf32, #tpu.memory_space<vmem>>, vector<8x128xf32>
      tpu.vector_store %arg7[%c0_33, %c0_34], %79 {strides = array<i32>} : memref<8x128xf32, #tpu.memory_space<vmem>>, vector<8x128xf32>,
    } else {
    }
    return
  }
  func.func @transform_0(%arg0: i32, %arg1: i32, %arg2: memref<1xi32, #tpu.memory_space<smem>>) -> (i32, i32) {
    %c1_i32 = arith.constant 1 : i32
    %0 = arith.muli %arg0, %c1_i32 : i32
    %1 = arith.addi %0, %arg1 : i32
    %c0_i32 = arith.constant 0 : i32
    %c0_i32_0 = arith.constant 0 : i32
    return %1, %c0_i32 : i32, i32
  }
  func.func @transform_1(%arg0: i32, %arg1: i32, %arg2: memref<1xi32, #tpu.memory_space<smem>>) -> (i32, i32) {
    %c0_i32 = arith.constant 0 : i32
    %c0_i32_0 = arith.constant 0 : i32
    %c0_i32_1 = arith.constant 0 : i32
    return %c0_i32, %c0_i32_0 : i32, i32
  }
  func.func @transform_2(%arg0: i32, %arg1: i32, %arg2: memref<1xi32, #tpu.memory_space<smem>>) -> (i32, i32) {
    %c1_i32 = arith.constant 1 : i32
    %0 = arith.muli %arg0, %c1_i32 : i32
    %1 = arith.addi %0, %arg1 : i32
    %c0_i32 = arith.constant 0 : i32
    %c0_i32_0 = arith.constant 0 : i32
    return %1, %c0_i32 : i32, i32
  }
  func.func @transform_3(%arg0: i32, %arg1: i32, %arg2: memref<1xi32, #tpu.memory_space<smem>>) -> (i32, i32) {
    %c0_i32 = arith.constant 0 : i32
    %c0_i32_0 = arith.constant 0 : i32
    return %arg0, %c0_i32 : i32, i32
  }
  func.func @transform_4(%arg0: i32, %arg1: i32, %arg2: memref<1xi32, #tpu.memory_space<smem>>) -> (i32, i32) {
    %c0_i32 = arith.constant 0 : i32
    %c0_i32_0 = arith.constant 0 : i32
    return %arg0, %c0_i32 : i32, i32
  }
}

</mosaic_0001>

<bundles_post_ra>
// kernel: tpu_custom_call.1
= control target key start
LH: loop header
LB: loop body
LE: loop exit
PB: predicated region body
PF: predicated region fallthrough
CT: control target
= control target key end

     0   :  { %s1244_s0 = inlined_call_operand.<no memory space> [shape: s32[1], index: 0, kind: input, shape index: {}]   ;;  %s1245_s1 = inlined_call_operand.vmem [shape: bf16[32,128], index: 1, kind: input, shape index: {}]   ;;  %s1246_s2 = inlined_call_operand.hbm [shape: bf16[128,128], index: 2, kind: input, shape index: {}]   ;;  %s1247_s3 = inlined_call_operand.vmem [shape: s32[32,1], index: 3, kind: input, shape index: {}]   ;;  %s1248_s4 = inlined_call_operand.hbm [shape: f32[16,128], index: 4, kind: output, shape index: {0}]   ;;  %s1249_s5 = inlined_call_operand.hbm [shape: f32[16,128], index: 5, kind: output, shape index: {1}]  }
   0x1   :  { %11 = sst [smem:[#allocation5]] %s1244_s0 }
   0x2   :  { %12 = vsyncpa [#allocation7], 0 }
   0x3   :  { %13 = vsyncpa [#allocation8], 0 }
   0x4   :  { %15 = vsyncpa [#allocation8 + $0x1], 0 }
   0x5   :  { %16 = vsyncpa [#allocation11], 0 }
   0x6   :  { %18 = vsyncpa [#allocation11 + $0x1], 0  ;;  %s1041_s20 = smov 0   ;;  %s1043_s21 = smov 0  }
   0x7   :  { %s1045_s22 = smov 0   ;;  %s1047_s23 = smov 0  }
   0x8   :  { %s1049_s24 = smov 0   ;;  %s1051_s25 = smov 0  }
   0x9 LB: > { %s696_s0 = sadd.s32 4294967295, %s998_s25   ;;  %s697_s26 = sadd.s32 4294967294, %s998_s25   ;;  %s998_s25 = sphi %s1051_s25, %s24_s25   ;;  %s994_s24 = sphi %s1049_s24, %s1258_s24   ;;  %s990_s23 = sphi %s1047_s23, %s1257_s23   ;;  %s986_s22 = sphi %s1045_s22, %s1256_s22   ;;  %s982_s21 = sphi %s1043_s21, %s1255_s21   ;;  %s978_s20 = sphi %s1041_s20, %s1254_s20  }
   0xa   : > { %s36_s27 = sadd.s32 1, %s994_s24  ;;  %s120_s28 = sadd.s32 1, %s986_s22 }
   0xb   : > { %p38_p0 = scmp.ge.s32.totalorder %s36_s27, 2  ;;  %p130_p1 = scmp.ne.s32.totalorder %s986_s22, %s982_s21 }
   0xc   : > { %p131_p2 = scmp.eq.s32.totalorder %s696_s0, 1  ;;  %p136_p3 = scmp.ne.s32.totalorder %s982_s21, %s978_s20 }
   0xd   : > { %s1260_s27 = smov (%p38_p0, %s36_s27), 0  ;;  %p137_p5 = scmp.eq.s32.totalorder %s697_s26, 1 }
   0xe   : > { %p1081_p4 = por %p131_p2, %p130_p1  ;;  %s117_s30 = ssub.s32 %s994_s24, %s1260_s27 }
   0xf   : > { %p698_p6 = scmp.ge.s32.totalorder %s998_s25, 1  ;;  %p118_p7 = scmp.eq.s32.totalorder %s117_s30, 0 }
  0x10   : > { %p1088_p8 = por %p137_p5, %p136_p3  ;;  %p170_p9 = scmp.lt.s32.totalorder %s998_s25, 3 }
  0x11   : > { %s1094_s7 = scalar_select %p118_p7, %s986_s22, %s120_s28  }
  0x12   : > { %p1096_p10 = pnand %p698_p6, %p170_p9  ;;  %p1100_p11 = scmp.eq.s32.totalorder %s696_s0, 0 }
  0x13   : > { %s1000_s10 = smov [#allocation6]  }
  0x14   : > { %p770_p12 = pneg %p1096_p10  ;;  %s182_s11 = sshll.u32 %s1000_s10, 4  ;;  %s183_s11 = int_to_ptr.vmem [resolvable:$true] %s182_s11 }
  0x15   : > { %s873_s12 = scalar_lea.vmem %s183_s11, 1024  ;;  %p881_p5 = scmp.lt.s32.totalorder %s183_s11, %s183_s11 }
  0x16   : > { %p771_p13 = pnand %p1100_p11, %p770_p12  ;;  %p874_p1 = scmp.ne.s32.totalorder %s183_s11, %s873_s12 }
  0x17   : > { %p882_p6 = scmp.lt.s32.totalorder %s873_s12, %s873_s12 }
  0x18   : > { %p864_p0 = pneg %p771_p13 }
  0x19   : > { %p883_p7 = por %p882_p6, %p881_p5 }
  0x1a   : > { %p876_p2 = pnand %p874_p1, %p864_p0 }
  0x1c   : > { %p877_p3 = pneg %p876_p2 }
  0x1e   : > { %p884_p9 = pnand %p883_p7, %p877_p3 }
  0x20   : > { %887 = shalt.err (!%p884_p9)
}
  0x21   : > { %s1001_s13 = smov 64   ;;  %s1002_s14 = smov 4  }
  0x22   : > { %773 = dma.hbm_to_vmem [thread:$0]  (!%p771_p13), %s1246_s2, 1024, %s183_s11, [#allocation7], %s1001_s13, %s1001_s13, %s1002_s14  }
  0x23   : > { %220 = sbr.rel (%p1096_p10) target bundleno = 972 (0x3cc), region = 32 }
  0x28   : > { %965 = dma.done.wait (%p1100_p11), [#allocation7], 1024  }
  0x29   : > { %967 = vsyncadd (%p1100_p11), [#allocation7], 4294966272  ;;  %s705_s17 = sshll.u32 %s990_s23, 1  ;;  %v1003_v0 = vmov 0.0   ;;  %vm1004_vm0 = vmmov 0   ;;  %v1005_v1 = vmov 0   ;;  %v303_v13 = vlaneseq }
  0x2a   : > { %740 = vmatprep.subr.bf16.mxu0 %v1003_v0  ;;  %282 = vst [vmem:[#allocation3] sm:$0x1] %v1003_v0  ;;  %756 = vmatprep.mubr.msk.bf16.mxu0 %vm1004_vm0, %v1003_v0  ;;  %p260_p10 = scmp.lt.s32.totalorder %s705_s17, 3  ;;  %v840_v2 = vld [vmem:[#allocation6 + $0x38] sm:$0xff]   ;;  %v841_v3 = vld [vmem:[#allocation6 + $0x30] sm:$0xff]   ;;  %v842_v6 = vld [vmem:[#allocation6 + $0x28] sm:$0xff]  }
  0x2b   : > { %838 = vset.pattern.permute.xlu1 %v1005_v1  ;;  %839 = vset.pattern.permute.xlu0 %v1005_v1  ;;  %v843_v7 = vld [vmem:[#allocation6 + $0x20] sm:$0xff]   ;;  %v844_v8 = vld [vmem:[#allocation6 + $0x18] sm:$0xff]   ;;  %v845_v9 = vld [vmem:[#allocation6 + $0x10] sm:$0xff]   ;;  %v1147_v14 = vand.u32 127, %v303_v13  ;;  %s720_s10 = sshll.u32 %s990_s23, 4  ;;  %v462_v35 = vshrl.u32 %v303_v13, 7 }
  0x2c   : > { %s1262_s17 = smov (!%p260_p10, %s705_s17), 3  ;;  %741 = vmatpush3.bf16.xpose.msra.mxu0 %v840_v2  ;;  %v846_v10 = vld [vmem:[#allocation6 + $0x8] sm:$0xff]   ;;  %v847_v11 = vld [vmem:[#allocation6] sm:$0xff]   ;;  %v464_v36 = vstv %s720_s10  ;;  %s275_s11 = sld [smem:[#allocation5]]  ;;  %vm478_vm6 = vcmask 7168   ;;  %vm280_vm8 = vcmask 0  }
  0x2d   : > { %s708_s18 = sshll.u32 %s1262_s17, 3  ;;  %742 = vmatprep.subr.bf16.mxu0 %v1003_v0  ;;  %s706_s28 = sshll.u32 %s1262_s17, 2  ;;  %vm400_vm1 = vcmp.lt.s32.totalorder %v1147_v14, 8  ;;  %v463_v37 = vadd.s32 8, %v462_v35  ;;  %v465_v38 = vadd.s32 %v464_v36, %v462_v35  ;;  %281 = vst.msk [vmem:[#allocation2] sm:$0x1] %vm280_vm8, %v1003_v0 }
  0x2e   : > { %s271_s26 = scalar_lea.vmem %s1247_s3, %s708_s18  ;;  %s263_s9 = scalar_lea.vmem %s1245_s1, %s706_s28 }
  0x2f   : > { %v1128_v4 = vld [vmem:[%s271_s26] sm:$0xff]  ;;  %v1131_v5 = vld [vmem:[%s271_s26 + $0x8] sm:$0xff]  ;;  %v466_v41 = vadd.s32 %v464_v36, %v463_v37  ;;  %vm467_vm4 = vcmp.lt.s32.totalorder %v465_v38, 16  ;;  %s1166_s13 = sand.u32 1, %s982_s21   ;;  %s727_s15 = sshll.u32 %s990_s23, 7 }
  0x30   : > { %424 = vperm.xlu1 %838, %v1128_v4   ;;  %v1144_v12 = vld [vmem:[%s263_s9] sm:$0xff]   ;;  %v721_v47 = vsel %vm467_vm4, 1.0, %v1003_v0  ;;  %s703_s14 = sshll.u32 %s1166_s13, 3  ;;  %s1177_s0 = scalar_lea.hbm %s1249_s5, %s727_s15 }
  0x31   : > { %vm468_vm5 = vcmp.lt.s32.totalorder %v466_v41, 16  ;;  %s257_s16 = scalar_lea.vmem [#allocation10], %s703_s14  ;;  %s547_s26 = scalar_lea.sflag [#allocation11], %s1166_s13 }
  0x32   : > { %v722_v49 = vsel %vm468_vm5, 1.0, %v1003_v0  ;;  %v439_v54 = vstv %s275_s11  ;;  %s573_s17 = sshll.u32 %s257_s16, 4  ;;  %s1006_s30 = smov [#allocation10]   ;;  %s574_s17 = int_to_ptr.vmem [resolvable:$true] %s573_s17 }
  0x33   : > { %vm440_vm7 = vcmp.eq.s32.totalorder %v1147_v14, %v439_v54  ;;  %vm451_vm9 = vcmp.eq.s32.totalorder %v1128_v4, %v439_v54  ;;  %vm452_vm10 = vcmp.eq.s32.totalorder %v1131_v5, %v439_v54  ;;  %s888_s28 = scalar_lea.vmem %s574_s17, 128  ;;  %s892_s8 = sshll.u32 %s1006_s30, 4  ;;  %s893_s8 = int_to_ptr.vmem [resolvable:$false] %s892_s8 }
  0x34   : > { %743 = vmatpush3.bf16.xpose.msra.mxu0 %v841_v3  ;;  %427 = vperm.xlu1 %838, %v1131_v5   ;;  %v718_v1 = vsel %vm451_vm9, 1.0, %v1003_v0  ;;  %p889_p11 = scmp.ne.s32.totalorder %s574_s17, %s888_s28  ;;  %s894_s9 = scalar_lea.vmem %s893_s8, 256 }
  0x35   : > { %744 = vmatprep.subr.bf16.mxu0 %v1003_v0  ;;  %p895_p0 = scmp.lt.s32.totalorder %s574_s17, %s893_s8  ;;  %p896_p1 = scmp.lt.s32.totalorder %s894_s9, %s888_s28 }
  0x36   : > { %p890_p12 = pnand %p889_p11, %p1081_p4 }
  0x37   : > { %p897_p2 = por %p896_p1, %p895_p0 }
  0x38   : > { %p891_p13 = pneg %p890_p12 }
  0x3a   : > { %p898_p3 = pnand %p897_p2, %p891_p13 }
  0x3c   : > { %745 = vmatpush3.bf16.xpose.msra.mxu0 %v842_v6 }
  0x3d   : > { %746 = vmatprep.subr.bf16.mxu0 %v1003_v0 }
  0x44   : > { %747 = vmatpush3.bf16.xpose.msra.mxu0 %v843_v7 }
  0x45   : > { %748 = vmatprep.subr.bf16.mxu0 %v1003_v0 }
  0x4c   : > { %749 = vmatpush3.bf16.xpose.msra.mxu0 %v844_v8 }
  0x4d   : > { %750 = vmatprep.subr.bf16.mxu0 %v1003_v0 }
  0x54   : > { %751 = vmatpush3.bf16.xpose.msra.mxu0 %v845_v9 }
  0x55   : > { %752 = vmatprep.subr.bf16.mxu0 %v1003_v0 }
  0x5c   : > { %753 = vmatpush3.bf16.xpose.msra.mxu0 %v846_v10  ;;  %v719_v10 = vsel %vm452_vm10, 1.0, %v1003_v0 }
  0x5d   : > { %754 = vmatprep.subr.bf16.mxu0 %v1003_v0  ;;  %v496_v0 = vunpack.c.l.bf16 %v1144_v12 }
  0x64   : > { %755 = vmatpush3.bf16.xpose.msra.mxu0 %v847_v11 }
  0x6b   : > { %757 = vmatmul.mubr.bf16.vlgmr.msra.gmra.mxu0 %v1144_v12 }
  0xab   : > { %v425_v27 = vpop.permute.xlu1 %424 }
  0xac   : > { %vm429_vm2 = vcmp.eq.s32.totalorder %v425_v27, %v1147_v14 }
  0xaf   : > { %v428_v29 = vpop.permute.xlu1 %427 }
  0xb0   : > { %vm430_vm3 = vcmp.eq.s32.totalorder %v428_v29, %v1147_v14 }
 0x12b   : > { %v393_v15 = vpop.f32.mrf.mxu0 }
 0x12c   : > { %v401_v16 = vsel %vm400_vm1, %v393_v15, -1e+30 }
 0x12d   : > { %403 = vmax.xlane.f32.xlu0 %v401_v16  ;;  %v758_v17 = vpop.f32.mrf.mxu0  ;;  %v431_v31 = vsel %vm429_vm2, %v401_v16, 0.0 }
 0x12f   : > { %v396_v18 = vpop.f32.mrf.mxu0 }
 0x130   : > { %v402_v19 = vsel %vm400_vm1, %v396_v18, -1e+30  ;;  %v477_v18 = vld [vmem:[#allocation2] sm:$0x1] }
 0x131   : > { %405 = vmax.xlane.f32.xlu0 %v402_v19  ;;  %v759_v20 = vpop.f32.mrf.mxu0  ;;  %v432_v32 = vsel %vm430_vm3, %v402_v19, 0.0 }
 0x1b6   : > { %v404_v21 = vpop.xlane.xlu0 %403 }
 0x1b7   : > { %v407_v22 = vsub.f32 %v401_v16, %v404_v21 }
 0x1b9   : > { %v409_v23 = vmul.f32 1.442695, %v407_v22 }
 0x1ba   : > { %v406_v24 = vpop.xlane.xlu0 %405 }
 0x1bb   : > { %850 = vpow2.f32 %v409_v23  ;;  %v408_v25 = vsub.f32 %v402_v19, %v406_v24 }
 0x1bd   : > { %v411_v26 = vmul.f32 1.442695, %v408_v25 }
 0x1bf   : > { %852 = vpow2.f32 %v411_v26 }
 0x1c8   : > { %v851_v28 = vpop.eup %850 }
 0x1c9   : > { %413 = vadd.xlane.f32.xlu0 %v851_v28  ;;  %v441_v58 = vsel %vm440_vm7, %v851_v28, 0.0 }
 0x1cc   : > { %v853_v30 = vpop.eup %852 }
 0x1cd   : > { %433 = vadd.xlane.f32.xlu0 %v431_v31  ;;  %415 = vadd.xlane.f32.xlu1 %v853_v30  ;;  %v442_v59 = vsel %vm440_vm7, %v853_v30, 0.0 }
 0x1d1   : > { %435 = vadd.xlane.f32.xlu0 %v432_v32  ;;  %v495_v32 = vld [vmem:[#allocation3] sm:$0x1] }
 0x252   : > { %v414_v33 = vpop.xlane.xlu0 %413 }
 0x253   : > { %854 = vlog2.f32 %v414_v33 }
 0x256   : > { %v416_v34 = vpop.xlane.xlu1 %415  ;;  %v434_v42 = vpop.xlane.xlu0 %433 }
 0x257   : > { %856 = vlog2.f32 %v416_v34 }
 0x258   : > { %858 = vrcp.f32 %v414_v33 }
 0x259   : > { %860 = vrcp.f32 %v416_v34 }
 0x25a   : > { %v436_v50 = vpop.xlane.xlu0 %435 }
 0x260   : > { %v855_v39 = vpop.eup %854 }
 0x261   : > { %v418_v40 = vmul.f32 0.6931472, %v855_v39 }
 0x263   : > { %v421_v43 = vadd.f32 %v418_v40, %v404_v21  ;;  %v497_v21 = vunpack.c.h.bf16 %v1144_v12 }
 0x264   : > { %v857_v44 = vpop.eup %856 }
 0x265   : > { %v437_v45 = vsub.f32 %v421_v43, %v434_v42  ;;  %v420_v46 = vmul.f32 0.6931472, %v857_v44  ;;  %v859_v63 = vpop.eup %858 }
 0x266   : > { %v861_v9 = vpop.eup %860 }
 0x267   : > { %v422_v48 = vadd.f32 %v420_v46, %v406_v24  ;;  %v473_v51 = vmul.f32 %v721_v47, %v437_v45 }
 0x269   : > { %v438_v52 = vsub.f32 %v422_v48, %v436_v50  ;;  %v479_v55 = vsel %vm478_vm6, %v473_v51, 0.0 }
 0x26b   : > { %v474_v53 = vmul.f32 %v722_v49, %v438_v52 }
 0x26d   : > { %v480_v56 = vsel %vm478_vm6, %v474_v53, 0.0 }
 0x26e   : > { %v481_v57 = vadd.f32 %v480_v56, %v479_v55 }
 0x270   : > { %482 = vadd.xlane.f32.xlu0 %v481_v57 }
 0x274   : > { %443 = vadd.xlane.f32.xlu0 %v441_v58 }
 0x278   : > { %445 = vadd.xlane.f32.xlu0 %v442_v59 }
 0x2f9   : > { %v483_v60 = vpop.xlane.xlu0 %482 }
 0x2fa   : > { %v484_v61 = vrot.slane %v483_v60, 4 }
 0x2fc   : > { %v485_v62 = vadd.f32 %v484_v61, %v483_v60 }
 0x2fd   : > { %v444_v2 = vpop.xlane.xlu0 %443 }
 0x2fe   : > { %v486_v3 = vrot.slane %v485_v62, 2  ;;  %v449_v6 = vmul.f32 %v859_v63, %v444_v2 }
 0x300   : > { %v457_v7 = vsub.f32 %v449_v6, %v718_v1  ;;  %v487_v8 = vadd.f32 %v486_v3, %v485_v62 }
 0x301   : > { %v446_v11 = vpop.xlane.xlu0 %445 }
 0x302   : > { %v450_v13 = vmul.f32 %v861_v9, %v446_v11  ;;  %v475_v14 = vmul.f32 %v721_v47, %v457_v7  ;;  %v488_v15 = vrot.slane %v487_v8, 1 }
 0x304   : > { %v458_v4 = vsub.f32 %v450_v13, %v719_v10  ;;  %500 = vperm.xlu0 %839, %v475_v14   ;;  %v489_v16 = vadd.f32 %v488_v15, %v487_v8 }
 0x306   : > { %760 = vpush %v489_v16  ;;  %v476_v17 = vmul.f32 %v722_v49, %v458_v4 }
 0x308   : > { %505 = vperm.xlu1 %838, %v476_v17  }
 0x337   : > { %s761_s12 = spop %760 }
 0x338   : > { %v491_v5 = vstv %s761_s12 }
 0x339   : > { %v492_v19 = vadd.f32 %v491_v5, %v477_v18 }
 0x33b   : > { %494 = vst.msk [vmem:[#allocation2] sm:$0x1] %vm280_vm8, %v492_v19 }
 0x342   : > { %v723_v20 = vld [vmem:[#allocation2] ss:$0 sm:$0xff] }
 0x343   : > { %529 = vperm.xlu1 %838, %v723_v20  }
 0x37f   : > { %v501_v22 = vpop.permute.xlu0 %500 }
 0x380   : > { %v508_v24 = vmul.f32 %v501_v22, %v496_v0 }
 0x383   : > { %v506_v23 = vpop.permute.xlu1 %505 }
 0x384   : > { %v509_v25 = vmul.f32 %v506_v23, %v497_v21 }
 0x386   : > { %v510_v26 = vadd.f32 %v509_v25, %v508_v24 }
 0x388   : > { %v511_v27 = vrot.slane %v510_v26, 4 }
 0x38a   : > { %v512_v28 = vadd.f32 %v511_v27, %v510_v26 }
 0x38c   : > { %v513_v29 = vrot.slane %v512_v28, 2 }
 0x38e   : > { %v514_v30 = vadd.f32 %v513_v29, %v512_v28 }
 0x390   : > { %v515_v31 = vrot.slane %v514_v30, 1 }
 0x392   : > { %v516_v33 = vadd.f32 %v515_v31, %v514_v30 }
 0x394   : > { %v517_v12 = vadd.f32 %v516_v33, %v495_v32 }
 0x396   : > { %518 = vst [vmem:[#allocation3] sm:$0x1] %v517_v12 }
 0x39d   : > { %v724_v34 = vld [vmem:[#allocation3] ss:$0 sm:$0xff] }
 0x39e   : > { %540 = vst [vmem:[%s257_s16] sm:$0xff] %v724_v34 }
 0x39f   : > { %901 = shalt.err (!%p898_p3)
}
 0x3a0   : > { %s902_s10 = scalar_lea.hbm %s1177_s0, 128  ;;  %s906_s16 = scalar_lea.hbm %s1249_s5, 256 }
 0x3a1   : > { %p903_p5 = scmp.ne.s32.totalorder %s1177_s0, %s902_s10  ;;  %p907_p9 = scmp.lt.s32.totalorder %s1177_s0, %s1249_s5 }
 0x3a2   : > { %p908_p10 = scmp.lt.s32.totalorder %s906_s16, %s902_s10 }
 0x3a3   : > { %p904_p6 = pnand %p903_p5, %p1081_p4 }
 0x3a4   : > { %p909_p11 = por %p908_p10, %p907_p9 }
 0x3a5   : > { %p905_p7 = pneg %p904_p6 }
 0x3a7   : > { %p910_p12 = pnand %p909_p11, %p905_p7 }
 0x3a9   : > { %913 = shalt.err (!%p910_p12)
}
 0x3aa   : > { %767 = dma.vmem_to_hbm [thread:$0]  (%p1081_p4), %s574_s17, 128, %s1177_s0, %s547_s26  }
 0x3ab   : > { %s250_s28 = scalar_lea.vmem [#allocation9], %s703_s14  ;;  %s558_s10 = scalar_lea.hbm %s1248_s4, %s727_s15 }
 0x3ac   : > { %s560_s30 = sshll.u32 %s250_s28, 4  ;;  %s542_s11 = scalar_lea.sflag [#allocation8], %s1166_s13  ;;  %s1198_s30 = int_to_ptr.vmem [resolvable:$true] %s560_s30 }
 0x3ad   : > { %s914_s12 = scalar_lea.vmem %s1198_s30, 128  ;;  %s1007_s14 = smov [#allocation9]  }
 0x3ae   : > { %p915_p13 = scmp.ne.s32.totalorder %s1198_s30, %s914_s12  ;;  %s918_s17 = sshll.u32 %s1007_s14, 4  ;;  %s919_s17 = int_to_ptr.vmem [resolvable:$false] %s918_s17 }
 0x3af   : > { %s920_s0 = scalar_lea.vmem %s919_s17, 256  ;;  %p921_p2 = scmp.lt.s32.totalorder %s1198_s30, %s919_s17 }
 0x3b0   : > { %p916_p0 = pnand %p915_p13, %p1081_p4  ;;  %p922_p3 = scmp.lt.s32.totalorder %s920_s0, %s914_s12 }
 0x3b2   : > { %p917_p1 = pneg %p916_p0  ;;  %p923_p5 = por %p922_p3, %p921_p2 }
 0x3b4   : > { %p924_p6 = pnand %p923_p5, %p917_p1 }
 0x3be   : > { %v530_v35 = vpop.permute.xlu1 %529 }
 0x3bf   : > { %532 = vst [vmem:[%s250_s28] sm:$0xff] %v530_v35 }
 0x3c0   : > { %927 = shalt.err (!%p924_p6)
}
 0x3c1   : > { %s928_s23 = scalar_lea.hbm %s558_s10, 128  ;;  %s932_s26 = scalar_lea.hbm %s1248_s4, 256 }
 0x3c2   : > { %p929_p7 = scmp.ne.s32.totalorder %s558_s10, %s928_s23  ;;  %p933_p11 = scmp.lt.s32.totalorder %s558_s10, %s1248_s4 }
 0x3c3   : > { %p934_p12 = scmp.lt.s32.totalorder %s932_s26, %s928_s23 }
 0x3c4   : > { %p930_p9 = pnand %p929_p7, %p1081_p4 }
 0x3c5   : > { %p935_p13 = por %p934_p12, %p933_p11 }
 0x3c6   : > { %p931_p10 = pneg %p930_p9 }
 0x3c8   : > { %p936_p0 = pnand %p935_p13, %p931_p10 }
 0x3ca   : > { %939 = shalt.err (!%p936_p0)
}
 0x3cb   : > { %766 = dma.vmem_to_hbm [thread:$0]  (%p1081_p4), %s1198_s30, 128, %s558_s10, %s542_s11  }
 0x3cc PF: > { %p783_p1 = scmp.ge.s32.totalorder %s998_s25, 2  ;;  %s585_s19 = sand.u32 1, %s978_s20  }
 0x3cd   : > { %s586_s28 = scalar_lea.sflag [#allocation8], %s585_s19 }
 0x3ce   : > { %p775_p2 = pnand %p783_p1, %p1088_p8 }
 0x3d0   : > { %p776_p3 = pneg %p775_p2 }
 0x3d2   : > { %969 = dma.done.wait (%p776_p3), %s586_s28, 128  }
 0x3d3   : > { %971 = vsyncadd (%p776_p3), %s586_s28, 4294967168  ;;  %s595_s8 = scalar_lea.sflag [#allocation11], %s585_s19 }
 0x3d4   : > { %973 = dma.done.wait (%p776_p3), %s595_s8, 128  }
 0x3d5   : > { %975 = vsyncadd (%p776_p3), %s595_s8, 4294967168  ;;  %s24_s25 = sadd.s32 1, %s998_s25   ;;  %s1254_s20 = smov %s982_s21 }
 0x3d6   : > { %p21_p5 = scmp.ge.s32.totalorder %s24_s25, 4   ;;  %s1255_s21 = smov %s986_s22 }
 0x3d7   : > { %s1256_s22 = smov %s1094_s7  ;;  %s1257_s23 = smov %s994_s24 }
 0x3d8   : > { %s1258_s24 = smov %s1260_s27  ;;  %23 = sbr.rel (!%p21_p5) target bundleno = 9 (0x9), region = 100 }
 0x3dd   :  { %600 = vsyncpa [#allocation7], 1 }
 0x3de   :  { %602 = vsyncpa [#allocation7 + $0x1], 1 }
 0x3df   :  { %603 = vsyncpa [#allocation8], 1 }
 0x3e0   :  { %605 = vsyncpa [#allocation8 + $0x1], 1 }
 0x3e1   :  { %606 = vsyncpa [#allocation11], 1 }
 0x3e2   :  { %608 = vsyncpa [#allocation11 + $0x1], 1 }

</bundles_post_ra>
